<compile_context>
chip_gen: v6e
topology: v6e:2x2x1
jax: 0.10.0
libtpu: 0.0.40
codegen_flags: <defaults>
</compile_context>

<pallas_src>
import functools
import math
import re

import numpy as np
import jax
import jax.numpy as jnp
from jax import lax
from jax.experimental import pallas as pl
from jax.experimental.pallas import tpu as pltpu

BINS = (3, 6, 9, 12)
LANE = 128


def _round_up(n, m):
    return ((n + m - 1) // m) * m


def _tpu_generation():
    try:
        kind = jax.devices()[0].device_kind.lower()
    except Exception:
        return 6
    m = re.search(r"(\d+)", kind)
    return int(m.group(1)) if m else 6


def _vmem_cap(gen):
    # v7x has 64 MiB physical VMEM per TC; v5e/v6e have 128 MiB.
    return (48 << 20) if gen >= 7 else (96 << 20)


def _choose_tile(hw, gen):
    # Generation-aware tile: v7x (64 MiB VMEM) -> 256 rows, v5e/v6e -> 512.
    cap = 256 if gen >= 7 else 512
    t = min(cap, _round_up(hw, 8))
    return t, _round_up(hw, t)


def _proj_vmem_limit(tp, ct, nf, gen):
    need = (2 * tp * ct * 2 + 2 * ct * nf * 2 + 2 * tp * nf * 2
            + 2 * nf * 4 + tp * nf * 4 + (4 << 20))
    return int(min(_vmem_cap(gen), max(need, 32 << 20)))


def _attn_vmem_limit(hw_pad, nf, tq, tk, cvp, gen):
    # TODO(synk): for extreme HW where even the double-buffered proj input
    # overruns the cap, the kv chunks should be streamed from HBM manually.
    need = (2 * hw_pad * nf * 2          # proj input, double-buffered bf16
            + 2 * tq * cvp * 2           # bf16 output, double-buffered
            + tq * cvp * 4 + 2 * tq * 4  # f32 acc / m / l scratch
            + 6 * tq * tk * 4            # per-chunk logits / p temporaries
            + (4 << 20))                 # headroom
    return int(min(_vmem_cap(gen), max(need, 32 << 20)))


# ----------------------------------------------------------------------------
# Kernel 1: fused q|k|v projection — row-tiled GEMM over all B*HW rows.
# Single 'parallel' grid axis so megacore can split it at any batch size.
# ----------------------------------------------------------------------------
def qkv_proj_kernel(x_ref, w_ref, b_ref, o_ref):
    acc = jnp.dot(x_ref[...], w_ref[...], preferred_element_type=jnp.float32)
    o_ref[...] = (acc + b_ref[...]).astype(o_ref.dtype)


def qkv_projection(x2d, w, b, *, tp, vmem_limit):
    rows, ct = x2d.shape
    nf = w.shape[1]
    return pl.pallas_call(
        qkv_proj_kernel,
        out_shape=jax.ShapeDtypeStruct((rows, nf), jnp.bfloat16),
        grid_spec=pltpu.PrefetchScalarGridSpec(
            num_scalar_prefetch=0,
            grid=(rows // tp,),
            in_specs=[
                pl.BlockSpec((tp, ct), lambda r: (r, 0)),
                pl.BlockSpec((ct, nf), lambda r: (0, 0)),
                pl.BlockSpec((1, nf), lambda r: (0, 0)),
            ],
            out_specs=pl.BlockSpec((tp, nf), lambda r: (r, 0)),
        ),
        compiler_params=pltpu.CompilerParams(
            dimension_semantics=("parallel",),
            vmem_limit_bytes=vmem_limit,
        ),
    )(x2d, w, b)


# ----------------------------------------------------------------------------
# Kernel 2: q-tiled attention with kv-chunked online softmax.
#   grid = (B, num_q_tiles), both axes 'parallel' (no cross-step state).
# ----------------------------------------------------------------------------
def pam_attn_kernel(proj_ref, out_ref, m_ref, l_ref, acc_ref, *,
                    csp, cvp, hw, tq, tk, exp_bf16):
    i = pl.program_id(1)
    row0 = pl.multiple_of(i * tq, tq)
    q = proj_ref[pl.ds(row0, tq), :csp]                     # (TQ, Csp) bf16

    m_ref[...] = jnp.full((tq, 1), -jnp.inf, jnp.float32)
    l_ref[...] = jnp.zeros((tq, 1), jnp.float32)
    acc_ref[...] = jnp.zeros((tq, cvp), jnp.float32)

    def process_chunk(col0, masked):
        k = proj_ref[pl.ds(col0, tk), csp:2 * csp]           # (TK, Csp) bf16
        v = proj_ref[pl.ds(col0, tk), 2 * csp:2 * csp + cvp]  # (TK, Cvp) bf16
        # logits chunk = q @ k^T without materializing the transpose; padded
        # query/key columns are zero so they contribute exactly nothing.
        s = lax.dot_general(q, k, (((1,), (1,)), ((), ())),
                            preferred_element_type=jnp.float32)  # (TQ, TK)
        if masked:
            col_ids = col0 + lax.broadcasted_iota(jnp.int32, (tq, tk), 1)
            s = jnp.where(col_ids < hw, s, -jnp.inf)
        m_prev = m_ref[...]
        m_new = jnp.maximum(m_prev, jnp.max(s, axis=-1, keepdims=True))
        alpha = jnp.exp(m_prev - m_new)
        if exp_bf16:                       # bf16 EUP path on v6e/v7x
            p = jnp.exp((s - m_new).astype(jnp.bfloat16))
        else:                              # f32 path on v5e and older
            p = jnp.exp(s - m_new)
        l_ref[...] = alpha * l_ref[...] + jnp.sum(
            p.astype(jnp.float32), axis=-1, keepdims=True)
        acc_ref[...] = alpha * acc_ref[...] + jnp.dot(
            p.astype(jnp.bfloat16), v, preferred_element_type=jnp.float32)
        m_ref[...] = m_new

    nkv_full = hw // tk
    if nkv_full == 1:
        process_chunk(0, masked=False)
    elif nkv_full > 1:
        @pl.loop(0, nkv_full)
        def _(kv):
            process_chunk(pl.multiple_of(kv * tk, tk), masked=False)
    if hw % tk != 0:
        process_chunk(nkv_full * tk, masked=True)    # ragged tail chunk

    # Deferred softmax normalization: scale the (TQ, Cvp) accumulator once.
    out_ref[...] = (acc_ref[...] *
                    pl.reciprocal(l_ref[...], approx=True)).astype(out_ref.dtype)


def pam_attention(proj, *, csp, cvp, hw, tq, tk, exp_bf16, vmem_limit):
    """proj: (B, HW_pad, Nf) bf16 -> (B, HW_pad, Cvp) bf16."""
    B, hw_pad, nf = proj.shape
    nq = hw_pad // tq
    kernel = functools.partial(pam_attn_kernel, csp=csp, cvp=cvp, hw=hw,
                               tq=tq, tk=tk, exp_bf16=exp_bf16)
    # TODO(synk): the proj input is i-invariant; pipeline_mode=pl.Buffered(1)
    # would halve its buffering, skipped here to keep the compile surface small.
    return pl.pallas_call(
        kernel,
        out_shape=jax.ShapeDtypeStruct((B, hw_pad, cvp), jnp.bfloat16),
        grid_spec=pltpu.PrefetchScalarGridSpec(
            num_scalar_prefetch=0,
            grid=(B, nq),
            in_specs=[pl.BlockSpec((None, hw_pad, nf), lambda b, i: (b, 0, 0))],
            out_specs=pl.BlockSpec((None, tq, cvp), lambda b, i: (b, i, 0)),
            scratch_shapes=[pltpu.VMEM((tq, 1), jnp.float32),
                            pltpu.VMEM((tq, 1), jnp.float32),
                            pltpu.VMEM((tq, cvp), jnp.float32)],
        ),
        compiler_params=pltpu.CompilerParams(
            dimension_semantics=("parallel", "parallel"),
            vmem_limit_bytes=vmem_limit,
        ),
    )(proj)


# ----------------------------------------------------------------------------
# Plain-JAX glue (PPM pooling / depthwise convs / bilinear resize), NCHW
# ----------------------------------------------------------------------------
def gelu(x):
    # nn.GELU() default is the exact (erf) form.
    return jax.nn.gelu(x, approximate=False)


def depthwise_conv3x3(x, w):
    # x: (B,C,H,W), w: (C,1,3,3), padding=1, no bias, groups=C
    return lax.conv_general_dilated(
        x, w, window_strides=(1, 1), padding=((1, 1), (1, 1)),
        dimension_numbers=('NCHW', 'OIHW', 'NCHW'),
        feature_group_count=x.shape[1])


def conv1x1(x, w, b):
    y = jnp.einsum('bchw,oc->bohw', x, w[:, :, 0, 0])
    return y + b[None, :, None, None]


def _adaptive_pool_matrix(in_size, out_size):
    M = np.zeros((out_size, in_size), np.float32)
    for i in range(out_size):
        start = (i * in_size) // out_size
        end = -((-(i + 1) * in_size) // out_size)  # ceil((i+1)*in/out)
        M[i, start:end] = 1.0 / (end - start)
    return jnp.asarray(M)


def adaptive_avg_pool(x, out_size):
    # Matches nn.AdaptiveAvgPool2d(out_size)
    _, _, H, W = x.shape
    Mr = _adaptive_pool_matrix(H, out_size)
    Mc = _adaptive_pool_matrix(W, out_size)
    return jnp.einsum('oh,bchw,pw->bcop', Mr, x, Mc)


def _bilinear_matrix(in_size, out_size):
    # F.interpolate(..., mode='bilinear', align_corners=True), separable 1-D
    M = np.zeros((out_size, in_size), np.float32)
    if out_size == 1:
        M[0, 0] = 1.0
        return jnp.asarray(M)
    for i in range(out_size):
        src = i * (in_size - 1) / (out_size - 1)
        lo = int(math.floor(src))
        hi = min(lo + 1, in_size - 1)
        frac = src - lo
        M[i, lo] += 1.0 - frac
        M[i, hi] += frac
    return jnp.asarray(M)


def bilinear_resize_nchw(x, out_h, out_w):
    _, _, H, W = x.shape
    Mr = _bilinear_matrix(H, out_h)
    Mc = _bilinear_matrix(W, out_w)
    return jnp.einsum('oh,bchw,pw->bcop', Mr, x, Mc)


def modify_ppm(x, ppm_params):
    H, W = x.shape[2], x.shape[3]
    out = [gelu(depthwise_conv3x3(x, ppm_params['local_w']))]
    for idx, b in enumerate(BINS):
        p = ppm_params['features'][idx]
        y = adaptive_avg_pool(x, b)
        y = gelu(conv1x1(y, p['w1'], p['b1']))
        y = gelu(depthwise_conv3x3(y, p['w2']))
        y = bilinear_resize_nchw(y, H, W)
        out.append(y)
    return jnp.concatenate(out, axis=1)


def _pad_cols(w2d, b1d, ncols):
    ct, n = w2d.shape
    wp = jnp.zeros((ct, ncols), w2d.dtype).at[:, :n].set(w2d)
    bp = jnp.zeros((ncols,), b1d.dtype).at[:n].set(b1d)
    return wp, bp


def multi_scale_pam(x, params):
    R = params['reduction_ratio']
    gen = _tpu_generation()

    # TODO(synk): the PPM / resize glue (adaptive pools, depthwise 3x3 convs,
    # bilinear einsums) stays in XLA; at toy sizes it dominates wall time over
    # the attention kernels.
    ms = modify_ppm(x, params['ppm'])
    enhanced = jnp.concatenate([x, ms], axis=1)          # (B, Ct, H, W)
    B, Ct, H, W = enhanced.shape
    h, w = H // R, W // R
    hw = h * w

    # Downsample straight into the kernel's channels-last layout (no extra HBM
    # transpose): (B, h, w, Ct) -> (B, HW, Ct), bf16 for the MXU.
    Mr_dn = _bilinear_matrix(H, h)
    Mc_dn = _bilinear_matrix(W, w)
    down_hwc = jnp.einsum('oh,bchw,pw->bopc', Mr_dn, enhanced, Mc_dn)
    xd = down_hwc.reshape(B, hw, Ct).astype(jnp.bfloat16)

    # Fused, lane-padded q|k|v projection weight: columns [0,Csp)=query,
    # [Csp,2Csp)=key, [2Csp,2Csp+Cvp)=value; zero-padded columns contribute
    # exactly zero to the logits contraction and keep every in-kernel slice
    # and the output store 128-lane aligned.
    # TODO(synk): k keeps its 128-lane padding (instead of the narrower q|v|k
    # layout) to keep the contraction width lane-aligned.
    Cs = params['query_w'].shape[0]
    Cin = params['value_w'].shape[0]
    Csp = _round_up(Cs, LANE)
    Cvp = _round_up(Cin, LANE)
    wq_p, bq_p = _pad_cols(params['query_w'][:, :, 0, 0].T, params['query_b'], Csp)
    wk_p, bk_p = _pad_cols(params['key_w'][:, :, 0, 0].T, params['key_b'], Csp)
    wv_p, bv_p = _pad_cols(params['value_w'][:, :, 0, 0].T, params['value_b'], Cvp)
    w_qkv = jnp.concatenate([wq_p, wk_p, wv_p], axis=1).astype(jnp.bfloat16)
    b_qkv = jnp.concatenate([bq_p, bk_p, bv_p])[None, :]          # (1, Nf) f32
    Nf = w_qkv.shape[1]

    # Generation-aware tile; pad HW to a tile multiple so any HW gets a
    # bounded, masked tail instead of a full (HW, HW) logits matrix.
    t, hw_pad = _choose_tile(hw, gen)
    if hw_pad != hw:
        xd = jnp.pad(xd, ((0, 0), (0, hw_pad - hw), (0, 0)))

    # Kernel 1: fused q|k|v projection over all B*HW_pad rows.
    proj2d = qkv_projection(xd.reshape(B * hw_pad, Ct), w_qkv, b_qkv,
                            tp=t, vmem_limit=_proj_vmem_limit(t, Ct, Nf, gen))
    proj = proj2d.reshape(B, hw_pad, Nf)

    # Kernel 2: q-tiled attention with kv-chunked online softmax, bf16 out.
    out_pad = pam_attention(
        proj, csp=Csp, cvp=Cvp, hw=hw, tq=t, tk=t,
        exp_bf16=(gen >= 6),
        vmem_limit=_attn_vmem_limit(hw_pad, Nf, t, t, Cvp, gen))

    # Consume the kernel output channels-last; the upsample einsum emits NCHW
    # directly, so no transpose pass is paid here either.
    out_hwc = out_pad[:, :hw, :Cin].reshape(B, h, w, Cin)
    Mr_up = _bilinear_matrix(h, H)
    Mc_up = _bilinear_matrix(w, W)
    out_nchw = jnp.einsum('oh,bhwc,pw->bcop', Mr_up, out_hwc, Mc_up)
    return params['gamma'] * out_nchw + x


# ----------------------------------------------------------------------------
# Deterministic parameter construction (shapes from MultiScalePAM.__init__)
# ----------------------------------------------------------------------------
def make_params(key, in_channels):
    scale_channels = in_channels // 8
    total_channels = in_channels + in_channels + 4 * scale_channels
    keys = jax.random.split(key, 32)
    ki = iter(keys)

    def rnd(shape, scale=0.05):
        return scale * jax.random.normal(next(ki), shape, dtype=jnp.float32)

    features = []
    for _ in BINS:
        features.append({
            'w1': rnd((scale_channels, in_channels, 1, 1)),
            'b1': rnd((scale_channels,)),
            'w2': rnd((scale_channels, 1, 3, 3)),
        })

    return {
        'reduction_ratio': 8,
        'ppm': {
            'local_w': rnd((in_channels, 1, 3, 3)),
            'features': features,
        },
        'query_w': rnd((scale_channels, total_channels, 1, 1)),
        'query_b': rnd((scale_channels,)),
        'key_w': rnd((scale_channels, total_channels, 1, 1)),
        'key_b': rnd((scale_channels,)),
        'value_w': rnd((in_channels, total_channels, 1, 1)),
        'value_b': rnd((in_channels,)),
        # nn.Parameter(torch.zeros(1)) in the module; set nonzero here so the
        # attention branch actually contributes to the output.
        'gamma': jnp.asarray(0.5, dtype=jnp.float32),
    }


if __name__ == "__main__":
    B, Cin, H, W = 2, 32, 32, 32          # H, W divisible by reduction_ratio=8
    x = jax.random.normal(jax.random.PRNGKey(0), (B, Cin, H, W), dtype=jnp.float32)
    params = make_params(jax.random.PRNGKey(1), Cin)

    y = multi_scale_pam(x, params)
    jax.block_until_ready(y)
    assert y.shape == (B, Cin, H, W)
    assert bool(jnp.all(jnp.isfinite(y)))
    print("KERNEL_OK")
</pallas_src>

<mosaic_0001>
module attributes {stable_mosaic.version = 11 : i64} {
  func.func @qkv_proj_kernel(%arg0: i32, %arg1: memref<16x80xbf16, #tpu.memory_space<vmem>>, %arg2: memref<80x384xbf16, #tpu.memory_space<vmem>>, %arg3: memref<1x384xf32, #tpu.memory_space<vmem>>, %arg4: memref<16x384xbf16, #tpu.memory_space<vmem>>) attributes {dimension_semantics = [#tpu.dimension_semantics<parallel>], iteration_bounds = array<i64: 2>, scalar_prefetch = 0 : i64, scratch_operands = 0 : i64, tpu.core_type = #tpu.core_type<tc>, window_params = [{transform_indices = @transform_0, window_bounds = array<i64: 16, 80>}, {pipeline_mode = #tpu.pipeline_mode<synchronous>, transform_indices = @transform_1, window_bounds = array<i64: 80, 384>}, {pipeline_mode = #tpu.pipeline_mode<synchronous>, transform_indices = @transform_2, window_bounds = array<i64: 1, 384>}, {transform_indices = @transform_3, window_bounds = array<i64: 16, 384>}]} {
    %c0 = arith.constant 0 : index
    %c0_0 = arith.constant 0 : index
    %0 = vector.load %arg1[%c0, %c0_0] : memref<16x80xbf16, #tpu.memory_space<vmem>>, vector<16x80xbf16>
    %c0_1 = arith.constant 0 : index
    %c0_2 = arith.constant 0 : index
    %1 = vector.load %arg2[%c0_1, %c0_2] : memref<80x384xbf16, #tpu.memory_space<vmem>>, vector<80x384xbf16>
    %cst = arith.constant dense<0.000000e+00> : vector<16x384xf32>
    %2 = tpu.matmul %0, %1, %cst {dimension_numbers = #tpu.dot_dimension_numbers<[1], [0], [0], [1], [0, 0, 1, 1], [], []>} : vector<16x80xbf16>, vector<80x384xbf16>, vector<16x384xf32> -> vector<16x384xf32>
    %c0_3 = arith.constant 0 : index
    %c0_4 = arith.constant 0 : index
    %3 = vector.load %arg3[%c0_3, %c0_4] : memref<1x384xf32, #tpu.memory_space<vmem>>, vector<1x384xf32>
    %4 = vector.broadcast %3 : vector<1x384xf32> to vector<16x384xf32>
    %5 = arith.addf %2, %4 : vector<16x384xf32>
    %6 = arith.truncf %5 : vector<16x384xf32> to vector<16x384xbf16>
    %c0_5 = arith.constant 0 : index
    %c0_6 = arith.constant 0 : index
    %7 = vector.load %arg4[%c0_5, %c0_6] : memref<16x384xbf16, #tpu.memory_space<vmem>>, vector<16x384xbf16>
    tpu.vector_store %arg4[%c0_5, %c0_6], %6 {strides = array<i32>} : memref<16x384xbf16, #tpu.memory_space<vmem>>, vector<16x384xbf16>,
    return
  }
  func.func @transform_0(%arg0: i32) -> (i32, i32) {
    %c0_i32 = arith.constant 0 : i32
    %c0_i32_0 = arith.constant 0 : i32
    return %arg0, %c0_i32 : i32, i32
  }
  func.func @transform_1(%arg0: i32) -> (i32, i32) {
    %c0_i32 = arith.constant 0 : i32
    %c0_i32_0 = arith.constant 0 : i32
    %c0_i32_1 = arith.constant 0 : i32
    return %c0_i32, %c0_i32_0 : i32, i32
  }
  func.func @transform_2(%arg0: i32) -> (i32, i32) {
    %c0_i32 = arith.constant 0 : i32
    %c0_i32_0 = arith.constant 0 : i32
    %c0_i32_1 = arith.constant 0 : i32
    return %c0_i32, %c0_i32_0 : i32, i32
  }
  func.func @transform_3(%arg0: i32) -> (i32, i32) {
    %c0_i32 = arith.constant 0 : i32
    %c0_i32_0 = arith.constant 0 : i32
    return %arg0, %c0_i32 : i32, i32
  }
}

</mosaic_0001>

<bundles_post_ra>
// kernel: tpu_custom_call.1
= control target key start
LH: loop header
LB: loop body
LE: loop exit
PB: predicated region body
PF: predicated region fallthrough
CT: control target
= control target key end

     0   :  { %8 = vsyncpa [#allocation3], 0  ;;  %s1032_s0 = inlined_call_operand.hbm [shape: bf16[32,80], index: 0, kind: input, shape index: {}]   ;;  %s1033_s1 = inlined_call_operand.hbm [shape: bf16[80,384], index: 1, kind: input, shape index: {}]   ;;  %s1034_s2 = inlined_call_operand.vmem [shape: f32[1,384], index: 2, kind: input, shape index: {}]   ;;  %s1035_s3 = inlined_call_operand.hbm [shape: bf16[32,384], index: 3, kind: output, shape index: {}]  }
   0x1   :  { %10 = vsyncpa [#allocation3 + $0x1], 0 }
   0x2   :  { %11 = vsyncpa [#allocation6], 0 }
   0x3   :  { %12 = vsyncpa [#allocation4], 0 }
   0x4   :  { %14 = vsyncpa [#allocation4 + $0x1], 0  ;;  %s848_s12 = smov 0   ;;  %s850_s13 = smov 0  }
   0x5   :  { %s852_s14 = smov 0   ;;  %s854_s15 = smov 0  }
   0x6 LB: > { %s869_s16 = sadd.s32 4294967295, %s814_s15   ;;  %s541_s17 = sadd.s32 4294967294, %s814_s15   ;;  %s814_s15 = sphi %s854_s15, %s1057_s15   ;;  %s810_s14 = sphi %s852_s14, %s1056_s14   ;;  %s806_s13 = sphi %s850_s13, %s1055_s13   ;;  %s802_s12 = sphi %s848_s12, %s1054_s12  }
   0x7   : > { %p40_p0 = scmp.ne.s32.totalorder %s806_s13, %s802_s12  ;;  %p1036_p1 = scmp.eq.s32.totalorder %s869_s16, 0 }
   0x8   : > { %p112_p3 = scmp.eq.s32.totalorder %s541_s17, 1  ;;  %p542_p5 = scmp.ge.s32.totalorder %s814_s15, 1 }
   0x9   : > { %p878_p4 = por %p1036_p1, %p40_p0  ;;  %p119_p7 = scmp.lt.s32.totalorder %s814_s15, 3 }
   0xa   : > { %p883_p6 = por %p112_p3, %p40_p0  ;;  %s816_s21 = smov [#allocation5]  }
   0xb   : > { %s1040_s18 = scalar_select %p878_p4, 1, 0 }
   0xc   : > { %s1041_s19 = scalar_select %p883_p6, 1, 0 }
   0xd   : > { %p888_p8 = pnand %p542_p5, %p119_p7  ;;  %s131_s22 = sshll.u32 %s816_s21, 4  ;;  %s132_s22 = int_to_ptr.vmem [resolvable:$true] %s131_s22 }
   0xe   : > { %s902_s24 = sadd.s32 1, %s814_s15   ;;  %s27_s25 = sadd.s32 1, %s810_s14 }
   0xf   : > { %s1042_s20 = scalar_select %p888_p8, 1, 0 }
  0x10   : > { %p613_p9 = pneg %p888_p8  ;;  %s24_s26 = ssub.s32 %s814_s15, %s902_s24 }
  0x11   : > { %s703_s27 = scalar_lea.vmem %s132_s22, 1920  ;;  %p711_p5 = scmp.lt.s32.totalorder %s132_s22, %s132_s22 }
  0x12   : > { %p897_p11 = pnand %p613_p9, %p1036_p1  ;;  %p704_p13 = scmp.ne.s32.totalorder %s132_s22, %s703_s27 }
  0x13   : > { %p712_p7 = scmp.lt.s32.totalorder %s703_s27, %s703_s27 }
  0x14   : > { %p694_p12 = pneg %p897_p11 }
  0x15   : > { %p713_p10 = por %p712_p7, %p711_p5 }
  0x16   : > { %p706_p0 = pnand %p704_p13, %p694_p12 }
  0x18   : > { %p707_p3 = pneg %p706_p0 }
  0x1a   : > { %p714_p2 = pnand %p713_p10, %p707_p3 }
  0x1c   : > { %717 = shalt.err (!%p714_p2)
}
  0x1d   : > { %s817_s28 = smov 192   ;;  %s818_s29 = smov 12  }
  0x1e   : > { %616 = dma.hbm_to_vmem [thread:$0]  (!%p897_p11), %s1033_s1, 1920, %s132_s22, [#allocation6], %s817_s28, %s817_s28, %s818_s29  }
  0x1f   : > { %p25_p9 = scmp.eq.s32.totalorder %s24_s26, 0  ;;  %p34_p12 = scmp.ne.s32.totalorder %s810_s14, %s806_s13 }
  0x20   : > { %p35_p10 = scmp.eq.s32.totalorder %s814_s15, 0  ;;  %p626_p2 = scmp.lt.s32.totalorder %s814_s15, 2 }
  0x21   : > { %s919_s5 = scalar_select %p25_p9, %s810_s14, %s27_s25  }
  0x22   : > { %p36_p13 = por %p35_p10, %p34_p12  ;;  %p1044_p0 = scmp.eq.s32.totalorder %s869_s16, 1 }
  0x23   : > { %s148_s7 = sand.u32 1, %s810_s14   ;;  %s578_s8 = sshll.u32 %s814_s15, 7 }
  0x24   : > { %p923_p3 = por %p1044_p0, %p34_p12  ;;  %s545_s9 = sshll.u32 %s148_s7, 3 }
  0x25   : > { %s932_s17 = scalar_lea.hbm %s1032_s0, %s578_s8  ;;  %s152_s21 = scalar_lea.vmem [#allocation2], %s545_s9 }
  0x26   : > { %s1045_s6 = scalar_select %p923_p3, 1, 0 }
  0x27   : > { %s159_s22 = sshll.u32 %s152_s21, 4  ;;  %p934_p11 = pnand %p626_p2, %p36_p13  ;;  %s938_s22 = int_to_ptr.vmem [resolvable:$true] %s159_s22 }
  0x28   : > { %s940_s25 = scalar_lea.sflag [#allocation3], %s148_s7  ;;  %s718_s26 = scalar_lea.hbm %s932_s17, 128 }
  0x29   : > { %p719_p5 = scmp.ne.s32.totalorder %s932_s17, %s718_s26  ;;  %p720_p7 = pneg %p934_p11 }
  0x2a   : > { %s723_s29 = scalar_lea.hbm %s1032_s0, 256  ;;  %p724_p10 = scmp.lt.s32.totalorder %s932_s17, %s1032_s0 }
  0x2b   : > { %p721_p9 = pnand %p720_p7, %p719_p5  ;;  %p725_p2 = scmp.lt.s32.totalorder %s723_s29, %s718_s26 }
  0x2d   : > { %p722_p12 = pneg %p721_p9  ;;  %p726_p13 = por %p725_p2, %p724_p10 }
  0x2f   : > { %p727_p0 = pnand %p726_p13, %p722_p12 }
  0x31   : > { %730 = shalt.err (!%p727_p0)
}
  0x32   : > { %s731_s7 = scalar_lea.vmem %s938_s22, 128  ;;  %s819_s8 = smov [#allocation2]  }
  0x33   : > { %p732_p1 = scmp.ne.s32.totalorder %s938_s22, %s731_s7  ;;  %s736_s9 = sshll.u32 %s819_s8, 4  ;;  %s737_s9 = int_to_ptr.vmem [resolvable:$false] %s736_s9 }
  0x34   : > { %s738_s10 = scalar_lea.vmem %s737_s9, 256  ;;  %p739_p9 = scmp.lt.s32.totalorder %s938_s22, %s737_s9 }
  0x35   : > { %p734_p6 = pnand %p732_p1, %p720_p7  ;;  %p740_p3 = scmp.lt.s32.totalorder %s738_s10, %s731_s7 }
  0x37   : > { %p735_p5 = pneg %p734_p6  ;;  %p741_p4 = por %p740_p3, %p739_p9 }
  0x39   : > { %p742_p8 = pnand %p741_p4, %p735_p5 }
  0x3b   : > { %745 = shalt.err (!%p742_p8)
}
  0x3c   : > { %s820_s11 = smov 64   ;;  %s821_s21 = smov 4  }
  0x3d   : > { %620 = dma.hbm_to_vmem [thread:$0]  (!%p934_p11), %s932_s17, 128, %s938_s22, %s940_s25, %s820_s11, %s820_s11, %s821_s21  }
  0x3e   : > { %p1047_p1 = scmp.ne.s32.totalorder %s1042_s20, 0 }
  0x3f   : > { %s964_s26 = sand.u32 (!%p1047_p1), 1, %s806_s13   ;;  %p1048_p4 = scmp.ne.s32.totalorder (!%p1047_p1), %s1040_s18, 0 }
  0x40   : > { %171 = sbr.rel (%p1047_p1) target bundleno = 312 (0x138), region = 32  ;;  %s549_s27 = sshll.u32 (!%p1047_p1), %s964_s26, 3 }
  0x41   : > { %s174_s28 = scalar_lea.sflag (!%p1047_p1), [#allocation3], %s964_s26  ;;  %s968_s29 = scalar_lea.vmem (!%p1047_p1), [#allocation2], %s549_s27 }
  0x45   : > { %789 = dma.done.wait (%p1048_p4), %s174_s28, 128  }
  0x46   : > { %791 = vsyncadd (%p1048_p4), %s174_s28, 4294967168  ;;  %p1049_p6 = scmp.eq.s32.totalorder %s869_s16, 0 }
  0x48   : > { %793 = dma.done.wait (%p1049_p6), [#allocation6], 1920   ;;  %p1050_p8 = pmov %p1049_p6 }
  0x49   : > { %v822_v0 = vmov 0.0   ;;  %vm823_vm0 = vmmov 0   ;;  %v824_v1 = vmov 0   ;;  %v671_v2 = vld [vmem:[#allocation5 + $0x64] ss:$12 sps:$4 sm:$0xff]   ;;  %vm331_vm1 = vcmask 654336  }
  0x4a   : > { %795 = vsyncadd (%p1050_p8), [#allocation6], 4294965376  ;;  %589 = vmatprep.subr.bf16.mxu1 %v822_v0  ;;  %599 = vmatprep.mubr.msk.bf16.mxu1 %vm823_vm0, %v822_v0  ;;  %v673_v3 = vld [vmem:[#allocation5 + $0x68] ss:$12 sps:$4 sm:$0xff]   ;;  %v674_v4 = vld [vmem:[#allocation5 + $0x60] ss:$12 sps:$4 sm:$0xff]   ;;  %v231_v18 = vlaneseq }
  0x4b   : > { %367 = vmatprep.mubr.bf16.mxu0 %v824_v1  ;;  %341 = vmatprep.subr.bf16.mxu0 %v671_v2  ;;  %v675_v5 = vld [vmem:[#allocation5 + $0x4c] ss:$12 sps:$4 sm:$0xff]   ;;  %v677_v6 = vld [vmem:[#allocation5 + $0x50] ss:$12 sps:$4 sm:$0xff]   ;;  %v678_v7 = vld [vmem:[#allocation5 + $0x48] ss:$12 sps:$4 sm:$0xff]  }
  0x4c   : > { %590 = vmatpush3.bf16.msra.mxu1 %v673_v3  ;;  %342 = vmatpush1.bf16.msra.mxu0 %v674_v4  ;;  %v679_v8 = vld [vmem:[#allocation5 + $0x34] ss:$12 sps:$4 sm:$0xff]   ;;  %v681_v9 = vld [vmem:[#allocation5 + $0x38] ss:$12 sps:$4 sm:$0xff]   ;;  %v682_v10 = vld [vmem:[#allocation5 + $0x30] ss:$12 sps:$4 sm:$0xff]  }
  0x4d   : > { %591 = vmatprep.subr.bf16.mxu1 %v822_v0  ;;  %343 = vmatprep.subr.bf16.mxu0 %v675_v5  ;;  %v683_v11 = vld [vmem:[#allocation5 + $0x1c] ss:$12 sps:$4 sm:$0xff]   ;;  %v685_v12 = vld [vmem:[#allocation5 + $0x20] ss:$12 sps:$4 sm:$0xff]   ;;  %v686_v13 = vld [vmem:[#allocation5 + $0x18] ss:$12 sps:$4 sm:$0xff]  }
  0x4e   : > { %v687_v14 = vld [vmem:[#allocation5 + $0x4] ss:$12 sps:$4 sm:$0xff]   ;;  %v689_v15 = vld [vmem:[#allocation5 + $0x8] ss:$12 sps:$4 sm:$0xff]   ;;  %v690_v16 = vld [vmem:[#allocation5] ss:$12 sps:$4 sm:$0xff]  }
  0x4f   : > { %v691_v17 = vld [vmem:[%s968_s29] sm:$0xff]   ;;  %v232_v19 = vshrl.u32 %v231_v18, 7  ;;  %s603_s17 = smul.u32 24, %s964_s26  ;;  %p1051_p11 = scmp.ne.s32.totalorder %s1045_s6, 0 }
  0x50   : > { %592 = vmatpush3.bf16.msra.mxu1 %v677_v6  ;;  %344 = vmatpush1.bf16.msra.mxu0 %v678_v7  ;;  %v229_v21 = vld [vmem:[%s1034_s2] sm:$0x7]  ;;  %s604_s25 = smul.u32 384, %s869_s16  ;;  %s444_s16 = scalar_lea.sflag [#allocation4], %s964_s26 }
  0x51   : > { %593 = vmatprep.subr.bf16.mxu1 %v822_v0  ;;  %345 = vmatprep.subr.bf16.mxu0 %v679_v8  ;;  %v241_v20 = vsub.s32 2, %v232_v19  ;;  %v233_v22 = vsub.s32 0, %v232_v19  ;;  %v237_v23 = vsub.s32 1, %v232_v19  ;;  %s203_s22 = scalar_lea.vmem [#allocation7], %s603_s17  ;;  %s825_s9 = smov [#allocation7]  }
  0x52   : > { %s458_s23 = sshll.u32 %s203_s22, 4  ;;  %s989_s7 = scalar_lea.hbm %s1035_s3, %s604_s25  ;;  %s984_s23 = int_to_ptr.vmem [resolvable:$true] %s458_s23 }
  0x53   : > { %v242_v24 = vrot.slane %v229_v21, %v241_v20  ;;  %v234_v26 = vrot.slane %v229_v21, %v233_v22  ;;  %v238_v27 = vrot.slane %v229_v21, %v237_v23  ;;  %s746_s8 = scalar_lea.vmem %s984_s23, 384  ;;  %s750_s10 = sshll.u32 %s825_s9, 4  ;;  %s751_s10 = int_to_ptr.vmem [resolvable:$false] %s750_s10 }
  0x54   : > { %594 = vmatpush3.bf16.msra.mxu1 %v681_v9  ;;  %346 = vmatpush1.bf16.msra.mxu0 %v682_v10  ;;  %p747_p3 = scmp.ne.s32.totalorder %s984_s23, %s746_s8  ;;  %s752_s11 = scalar_lea.vmem %s751_s10, 768 }
  0x55   : > { %595 = vmatprep.subr.bf16.mxu1 %v822_v0  ;;  %347 = vmatprep.subr.bf16.mxu0 %v683_v11  ;;  %p753_p10 = scmp.lt.s32.totalorder %s984_s23, %s751_s10  ;;  %p754_p2 = scmp.lt.s32.totalorder %s752_s11, %s746_s8 }
  0x56   : > { %p748_p7 = pnand %p747_p3, %p1051_p11 }
  0x57   : > { %p755_p13 = por %p754_p2, %p753_p10 }
  0x58   : > { %596 = vmatpush3.bf16.msra.mxu1 %v685_v12  ;;  %348 = vmatpush1.bf16.msra.mxu0 %v686_v13  ;;  %p749_p12 = pneg %p748_p7 }
  0x59   : > { %597 = vmatprep.subr.bf16.mxu1 %v822_v0  ;;  %349 = vmatprep.subr.bf16.mxu0 %v687_v14 }
  0x5a   : > { %p756_p0 = pnand %p755_p13, %p749_p12 }
  0x5c   : > { %598 = vmatpush3.bf16.msra.mxu1 %v689_v15  ;;  %350 = vmatpush1.bf16.msra.mxu0 %v690_v16 }
  0x5f   : > { %600 = vmatmul.mubr.msk.bf16.vlgmr.msra.gmra.mxu1 %vm331_vm1, %v691_v17  ;;  %567 = vmatmul.mubr.msk.bf16.vlgmr.msra.gmra.mxu0 %vm331_vm1, %v691_v17 }
 0x11f   : > { %v412_v25 = vpop.f32.mrf.mxu1  ;;  %v369_v29 = vpop.f32.mrf.mxu0 }
 0x120   : > { %v413_v28 = vadd.f32 %v412_v25, %v242_v24  ;;  %v370_v33 = vadd.f32 %v369_v29, %v234_v26 }
 0x121   : > { %v601_v30 = vpop.f32.mrf.mxu1  ;;  %v371_v32 = vpop.f32.mrf.mxu0 }
 0x122   : > { %v580_v31 = vpack.c.bf16 %v413_v28, %v413_v28  ;;  %v372_v34 = vadd.f32 %v371_v32, %v238_v27 }
 0x123   : > { %v415_v35 = vpop.f32.mrf.mxu1  ;;  %v373_v37 = vpop.f32.mrf.mxu0 }
 0x124   : > { %440 = vst [vmem:[%s203_s22 + $0x8] sm:$0xf] %v580_v31  ;;  %v416_v36 = vadd.f32 %v415_v35, %v242_v24  ;;  %v579_v38 = vpack.c.bf16 %v372_v34, %v370_v33  ;;  %v374_v42 = vadd.f32 %v373_v37, %v234_v26 }
 0x125   : > { %v602_v39 = vpop.f32.mrf.mxu1  ;;  %v375_v41 = vpop.f32.mrf.mxu0 }
 0x126   : > { %v582_v40 = vpack.c.bf16 %v416_v36, %v416_v36  ;;  %439 = vst [vmem:[%s203_s22] sm:$0xff] %v579_v38  ;;  %v376_v43 = vadd.f32 %v375_v41, %v238_v27 }
 0x128   : > { %442 = vst [vmem:[%s203_s22 + $0x14] sm:$0xf] %v582_v40  ;;  %v581_v44 = vpack.c.bf16 %v376_v43, %v374_v42 }
 0x12a   : > { %441 = vst [vmem:[%s203_s22 + $0xc] sm:$0xff] %v581_v44 }
 0x12b   : > { %759 = shalt.err (!%p756_p0)
}
 0x12c   : > { %s760_s21 = scalar_lea.hbm %s989_s7, 384  ;;  %s764_s29 = scalar_lea.hbm %s1035_s3, 768 }
 0x12d   : > { %p761_p5 = scmp.ne.s32.totalorder %s989_s7, %s760_s21  ;;  %p765_p4 = scmp.lt.s32.totalorder %s989_s7, %s1035_s3 }
 0x12e   : > { %p766_p6 = scmp.lt.s32.totalorder %s764_s29, %s760_s21 }
 0x12f   : > { %p762_p9 = pnand %p761_p5, %p1051_p11 }
 0x130   : > { %p767_p8 = por %p766_p6, %p765_p4 }
 0x131   : > { %p763_p1 = pneg %p762_p9 }
 0x133   : > { %p768_p3 = pnand %p767_p8, %p763_p1 }
 0x135   : > { %771 = shalt.err (!%p768_p3)
}
 0x136   : > { %s826_s17 = smov 192   ;;  %s827_s22 = smov 12  }
 0x137   : > { %611 = dma.vmem_to_hbm [thread:$0]  (%p1051_p11), %s984_s23, 384, %s989_s7, %s444_s16, %s826_s17, %s826_s17, %s827_s22  }
 0x138 PF: > { %s473_s25 = sand.u32 1, %s802_s12   ;;  %p1052_p7 = scmp.ne.s32.totalorder %s1041_s19, 0 }
 0x139   : > { %p1053_p12 = scmp.ge.s32.totalorder %s814_s15, 2  ;;  %s474_s30 = scalar_lea.sflag [#allocation4], %s473_s25 }
 0x13b   : > { %p622_p10 = pnand %p1053_p12, %p1052_p7 }
 0x13d   : > { %p623_p2 = pneg %p622_p10 }
 0x13f   : > { %797 = dma.done.wait (%p623_p2), %s474_s30, 384  }
 0x140   : > { %799 = vsyncadd (%p623_p2), %s474_s30, 4294966912  ;;  %p17_p13 = scmp.ge.s32.totalorder %s902_s24, 4   ;;  %s1054_s12 = smov %s806_s13 }
 0x141   : > { %s1055_s13 = smov %s810_s14  ;;  %s1056_s14 = smov %s919_s5 }
 0x142   : > { %s1057_s15 = smov %s902_s24  ;;  %19 = sbr.rel (!%p17_p13) target bundleno = 6 (0x6), region = 81 }
 0x147   :  { %479 = vsyncpa [#allocation3], 1 }
 0x148   :  { %481 = vsyncpa [#allocation3 + $0x1], 1 }
 0x149   :  { %482 = vsyncpa [#allocation6], 1 }
 0x14a   :  { %483 = vsyncpa [#allocation4], 1 }
 0x14b   :  { %485 = vsyncpa [#allocation4 + $0x1], 1 }

</bundles_post_ra>
